<compile_context>
chip_gen: v5e
topology: v5e:2x2
jax: 0.10.0
libtpu: 0.0.40
codegen_flags: <defaults>
</compile_context>

<pallas_src>
import jax
import jax.numpy as jnp
from jax import lax
from jax.experimental import pallas as pl
from jax.experimental.pallas import tpu as pltpu


def _round_up(x, m):
    return ((x + m - 1) // m) * m


def _choose_tiles(B, S, H, dtype):
    """Pick (TB, TS) so one x tile is ~<=4 MiB and (8,128)-rule friendly."""
    itemsize = jnp.dtype(dtype).itemsize
    TB = 8  # sublane-aligned batch tile
    budget = 4 * 1024 * 1024  # bytes per x tile (x2 buffers still < 16 MiB scoped)
    ts_max = max(8, budget // (TB * H * itemsize))
    ts_max = max(8, (ts_max // 8) * 8)
    s8 = _round_up(S, 8)
    TS = min(ts_max, s8, 512)
    TS = max(8, (TS // 8) * 8)
    return TB, TS


def _max_pool_fc_kernel(x_ref, w_ref, b_ref, o_ref, acc_ref):
    # x_ref: (TB, TS, H)  w_ref: (C, H)  b_ref: (1, C)  o_ref: (TB, C)
    # acc_ref: (TB, H) f32 running max, resident across the sequence axis.
    k = pl.program_id(1)

    @pl.when(k == 0)
    def _init():
        acc_ref[...] = jnp.full_like(acc_ref, -jnp.inf)

    chunk = x_ref[...]                                   # (TB, TS, H)
    chunk_max = jnp.max(chunk, axis=1)                   # (TB, H) small XLU reduce
    acc_ref[...] = jnp.maximum(acc_ref[...], chunk_max.astype(jnp.float32))

    @pl.when(k == pl.num_programs(1) - 1)
    def _finalize():
        pooled = acc_ref[...].astype(w_ref.dtype)        # (TB, H)
        # Contract over H with weight in (C, H) layout -> (TB, C) on the MXU.
        out = lax.dot_general(
            pooled, w_ref[...],
            dimension_numbers=(((1,), (1,)), ((), ())),
            preferred_element_type=jnp.float32)
        out = out + b_ref[...].astype(jnp.float32)
        o_ref[...] = out.astype(o_ref.dtype)


def bert_max_pooling_header(hidden_states, weight, bias):
    """hidden_states: (B, S, H); weight: (C, H) PyTorch layout; bias: (C,)."""
    B, S, H = hidden_states.shape
    C = weight.shape[0]
    dtype = hidden_states.dtype

    TB, TS = _choose_tiles(B, S, H, dtype)
    B_pad = _round_up(B, TB)
    S_pad = _round_up(S, TS)

    x = hidden_states
    if S_pad != S:
        # Pad sequence with the most-negative finite value so max ignores it.
        neg = jnp.asarray(jnp.finfo(dtype).min, dtype)
        x = jnp.pad(x, ((0, 0), (0, S_pad - S), (0, 0)), constant_values=neg)
    if B_pad != B:
        # Padded batch rows are zeros; their outputs are sliced off below.
        x = jnp.pad(x, ((0, B_pad - B), (0, 0), (0, 0)))

    b2d = bias.reshape(1, C)

    out_padded = pl.pallas_call(
        _max_pool_fc_kernel,
        out_shape=jax.ShapeDtypeStruct((B_pad, C), dtype),
        grid_spec=pltpu.PrefetchScalarGridSpec(
            num_scalar_prefetch=0,
            grid=(B_pad // TB, S_pad // TS),
            in_specs=[
                pl.BlockSpec((TB, TS, H), lambda i, k: (i, k, 0)),
                pl.BlockSpec((C, H), lambda i, k: (0, 0)),
                pl.BlockSpec((1, C), lambda i, k: (0, 0)),
            ],
            out_specs=pl.BlockSpec((TB, C), lambda i, k: (i, 0)),
            scratch_shapes=[pltpu.VMEM((TB, H), jnp.float32)],
        ),
        compiler_params=pltpu.CompilerParams(
            dimension_semantics=("parallel", "arbitrary")),
    )(x, weight, b2d)

    return out_padded[:B]


if __name__ == "__main__":
    key = jax.random.PRNGKey(0)

    def run_case(B, S, H, C, dtype=jnp.float32, tol=1e-5):
        kx, kw, kb = jax.random.split(jax.random.fold_in(key, B * 1000 + S), 3)
        x = jax.random.normal(kx, (B, S, H), dtype=dtype)
        bound = 1.0 / (H ** 0.5)
        weight = jax.random.uniform(kw, (C, H), minval=-bound, maxval=bound,
                                    dtype=dtype)
        bias = jax.random.uniform(kb, (C,), minval=-bound, maxval=bound,
                                  dtype=dtype)

        out = bert_max_pooling_header(x, weight, bias)
        out = jax.block_until_ready(out)

        ref = (jnp.max(x, axis=1).astype(jnp.float32)
               @ weight.T.astype(jnp.float32)
               + bias.astype(jnp.float32)).astype(dtype)
        assert out.shape == (B, C), f"bad shape {out.shape}"
        assert jnp.allclose(out.astype(jnp.float32), ref.astype(jnp.float32),
                            atol=tol, rtol=tol), "mismatch vs reference"

    # Small shapes implied by the forward: batch=2, seq=8, hidden=32, classes=4.
    run_case(2, 8, 32, 4)
    # Exercise the batch / sequence padding path (non-multiples of the tiles).
    run_case(3, 12, 32, 4)

    print("KERNEL_OK")
</pallas_src>

<mosaic_0001>
module attributes {stable_mosaic.version = 11 : i64} {
  func.func @_max_pool_fc_kernel(%arg0: i32, %arg1: i32, %arg2: memref<8x8x32xf32, #tpu.memory_space<vmem>>, %arg3: memref<4x32xf32, #tpu.memory_space<vmem>>, %arg4: memref<1x4xf32, #tpu.memory_space<vmem>>, %arg5: memref<8x4xf32, #tpu.memory_space<vmem>>, %arg6: memref<8x32xf32, #tpu.memory_space<vmem>>) attributes {dimension_semantics = [#tpu.dimension_semantics<parallel>, #tpu.dimension_semantics<arbitrary>], iteration_bounds = array<i64: 1, 1>, scalar_prefetch = 0 : i64, scratch_operands = 1 : i64, tpu.core_type = #tpu.core_type<tc>, window_params = [{transform_indices = @transform_0, window_bounds = array<i64: 8, 8, 32>}, {pipeline_mode = #tpu.pipeline_mode<synchronous>, transform_indices = @transform_1, window_bounds = array<i64: 4, 32>}, {pipeline_mode = #tpu.pipeline_mode<synchronous>, transform_indices = @transform_2, window_bounds = array<i64: 1, 4>}, {transform_indices = @transform_3, window_bounds = array<i64: 8, 4>}]} {
    %c0_i32 = arith.constant 0 : i32
    %0 = arith.cmpi eq, %arg1, %c0_i32 : i32
    %1 = arith.extui %0 : i1 to i32
    %c0_i32_0 = arith.constant 0 : i32
    %2 = arith.cmpi ne, %1, %c0_i32_0 : i32
    scf.if %2 {
      %cst_9 = arith.constant 0xFF800000 : f32
      %11 = vector.broadcast %cst_9 : f32 to vector<8x32xf32>
      %c0_10 = arith.constant 0 : index
      %c0_11 = arith.constant 0 : index
      %12 = vector.load %arg6[%c0_10, %c0_11] : memref<8x32xf32, #tpu.memory_space<vmem>>, vector<8x32xf32>
      tpu.vector_store %arg6[%c0_10, %c0_11], %11 {strides = array<i32>} : memref<8x32xf32, #tpu.memory_space<vmem>>, vector<8x32xf32>,
    } else {
    }
    %c0 = arith.constant 0 : index
    %c0_1 = arith.constant 0 : index
    %c0_2 = arith.constant 0 : index
    %3 = vector.load %arg2[%c0, %c0_1, %c0_2] : memref<8x8x32xf32, #tpu.memory_space<vmem>>, vector<8x8x32xf32>
    %cst = arith.constant dense<0xFF800000> : vector<8x32xf32>
    %4 = vector.multi_reduction <maximumf>, %3, %cst [1] : vector<8x8x32xf32> to vector<8x32xf32>
    %c0_3 = arith.constant 0 : index
    %c0_4 = arith.constant 0 : index
    %5 = vector.load %arg6[%c0_3, %c0_4] : memref<8x32xf32, #tpu.memory_space<vmem>>, vector<8x32xf32>
    %6 = arith.maximumf %5, %4 : vector<8x32xf32>
    %c0_5 = arith.constant 0 : index
    %c0_6 = arith.constant 0 : index
    %7 = vector.load %arg6[%c0_5, %c0_6] : memref<8x32xf32, #tpu.memory_space<vmem>>, vector<8x32xf32>
    tpu.vector_store %arg6[%c0_5, %c0_6], %6 {strides = array<i32>} : memref<8x32xf32, #tpu.memory_space<vmem>>, vector<8x32xf32>,
    %c0_i32_7 = arith.constant 0 : i32
    %8 = arith.cmpi eq, %arg1, %c0_i32_7 : i32
    %9 = arith.extui %8 : i1 to i32
    %c0_i32_8 = arith.constant 0 : i32
    %10 = arith.cmpi ne, %9, %c0_i32_8 : i32
    scf.if %10 {
      %c0_9 = arith.constant 0 : index
      %c0_10 = arith.constant 0 : index
      %11 = vector.load %arg6[%c0_9, %c0_10] : memref<8x32xf32, #tpu.memory_space<vmem>>, vector<8x32xf32>
      %c0_11 = arith.constant 0 : index
      %c0_12 = arith.constant 0 : index
      %12 = vector.load %arg3[%c0_11, %c0_12] : memref<4x32xf32, #tpu.memory_space<vmem>>, vector<4x32xf32>
      %cst_13 = arith.constant dense<0.000000e+00> : vector<8x4xf32>
      %13 = tpu.matmul %11, %12, %cst_13 {dimension_numbers = #tpu.dot_dimension_numbers<[1], [1], [0], [0], [0, 0, 1, 0], [], []>} : vector<8x32xf32>, vector<4x32xf32>, vector<8x4xf32> -> vector<8x4xf32>
      %c0_14 = arith.constant 0 : index
      %c0_15 = arith.constant 0 : index
      %14 = vector.load %arg4[%c0_14, %c0_15] : memref<1x4xf32, #tpu.memory_space<vmem>>, vector<1x4xf32>
      %15 = vector.broadcast %14 : vector<1x4xf32> to vector<8x4xf32>
      %16 = arith.addf %13, %15 : vector<8x4xf32>
      %c0_16 = arith.constant 0 : index
      %c0_17 = arith.constant 0 : index
      %17 = vector.load %arg5[%c0_16, %c0_17] : memref<8x4xf32, #tpu.memory_space<vmem>>, vector<8x4xf32>
      tpu.vector_store %arg5[%c0_16, %c0_17], %16 {strides = array<i32>} : memref<8x4xf32, #tpu.memory_space<vmem>>, vector<8x4xf32>,
    } else {
    }
    return
  }
  func.func @transform_0(%arg0: i32, %arg1: i32) -> (i32, i32, i32) {
    %c0_i32 = arith.constant 0 : i32
    %c0_i32_0 = arith.constant 0 : i32
    return %arg0, %arg1, %c0_i32 : i32, i32, i32
  }
  func.func @transform_1(%arg0: i32, %arg1: i32) -> (i32, i32) {
    %c0_i32 = arith.constant 0 : i32
    %c0_i32_0 = arith.constant 0 : i32
    %c0_i32_1 = arith.constant 0 : i32
    return %c0_i32, %c0_i32_0 : i32, i32
  }
  func.func @transform_2(%arg0: i32, %arg1: i32) -> (i32, i32) {
    %c0_i32 = arith.constant 0 : i32
    %c0_i32_0 = arith.constant 0 : i32
    %c0_i32_1 = arith.constant 0 : i32
    return %c0_i32, %c0_i32_0 : i32, i32
  }
  func.func @transform_3(%arg0: i32, %arg1: i32) -> (i32, i32) {
    %c0_i32 = arith.constant 0 : i32
    %c0_i32_0 = arith.constant 0 : i32
    return %arg0, %c0_i32 : i32, i32
  }
}

</mosaic_0001>

<bundles_post_ra>
// kernel: tpu_custom_call.1
= control target key start
LH: loop header
LB: loop body
LE: loop exit
PB: predicated region body
PF: predicated region fallthrough
CT: control target
= control target key end

     0   :  { %8 = vsyncpa [#allocation4], 0  ;;  %s297_s0 = inlined_call_operand.hbm [shape: f32[8,8,32], index: 0, kind: input, shape index: {}]   ;;  %s298_s1 = inlined_call_operand.hbm [shape: f32[4,32], index: 1, kind: input, shape index: {}]   ;;  %s299_s2 = inlined_call_operand.vmem [shape: f32[1,4], index: 2, kind: input, shape index: {}]   ;;  %s300_s3 = inlined_call_operand.vmem [shape: f32[8,4], index: 3, kind: output, shape index: {}]  }
   0x1   :  { %s14_s14 = sshll.u32 %s297_s0, 4  ;;  %s15_s14 = int_to_ptr.hbm [resolvable:$true] %s14_s14 }
   0x2   :  { %9 = vsyncpa [#allocation6], 0  ;;  %s244_s15 = smov [#allocation3]   ;;  %s28_s19 = sshll.u32 %s298_s1, 4  ;;  %s29_s19 = int_to_ptr.hbm [resolvable:$true] %s28_s19 }
   0x3   :  { %s16_s16 = sshll.u32 %s244_s15, 4  ;;  %s245_s20 = smov 128   ;;  %s17_s16 = int_to_ptr.vmem [resolvable:$true] %s16_s16 }
   0x4   :  { %s246_s21 = smov 8   ;;  %s247_s22 = smov [#allocation5]  }
   0x5   :  { %22 = dma.hbm_to_vmem [thread:$0]  %s15_s14, 1024, %s17_s16, [#allocation4], %s245_s20, %s245_s20, %s246_s21  }
   0x6   :  { %s30_s23 = sshll.u32 %s247_s22, 4  ;;  %s31_s23 = int_to_ptr.vmem [resolvable:$true] %s30_s23 }
   0x7   :  { %33 = dma.hbm_to_vmem [thread:$0]  %s29_s19, 64, %s31_s23, [#allocation6]  }
   0x8   :  { %240 = dma.done.wait [#allocation4], 1024  }
   0x9   :  { %241 = vsyncadd [#allocation4], 4294966272 }
   0xa   :  { %242 = dma.done.wait [#allocation6], 64  }
   0xb   :  { %243 = vsyncadd [#allocation6], 4294967232  ;;  %vm48_vm0 = vcmask 261120   ;;  %v248_v0 = vmov -inf   ;;  %v145_v1 = vld [vmem:[#allocation5] sm:$0xf] }
   0xc   :  { %49 = vst.msk [vmem:[#allocation2] sm:$0xff] %vm48_vm0, %v248_v0  ;;  %v50_v2 = vld [vmem:[#allocation3] sm:$0xff]  ;;  %v51_v3 = vld [vmem:[#allocation3 + $0x8] sm:$0xff]  ;;  %184 = vmatpush.xpose.msk.msra.mxu0 %vm48_vm0, %v145_v1  ;;  %v52_v4 = vld [vmem:[#allocation3 + $0x10] sm:$0xff]  ;;  %vm124_vm1 = vcmask 1041409   ;;  %vm126_vm2 = vcmask 1042434  }
   0xd   :  { %v53_v5 = vld [vmem:[#allocation3 + $0x18] sm:$0xff]  ;;  %v54_v6 = vld [vmem:[#allocation3 + $0x20] sm:$0xff]  ;;  %v59_v7 = vsel %vm48_vm0, %v50_v2, -inf  ;;  %v66_v8 = vsel %vm48_vm0, %v51_v3, -inf  ;;  %v55_v9 = vld [vmem:[#allocation3 + $0x28] sm:$0xff]  ;;  %v73_v14 = vsel %vm48_vm0, %v52_v4, -inf }
   0xe   :  { %v56_v10 = vld [vmem:[#allocation3 + $0x30] sm:$0xff]  ;;  %v57_v11 = vld [vmem:[#allocation3 + $0x38] sm:$0xff]  ;;  %v60_v12 = vrot.slane %v59_v7, 4  ;;  %v67_v13 = vrot.slane %v66_v8, 4  ;;  %v74_v15 = vrot.slane %v73_v14, 4  ;;  %v80_v16 = vsel %vm48_vm0, %v53_v5, -inf }
   0xf   :  { %v87_v17 = vsel %vm48_vm0, %v54_v6, -inf  ;;  %v94_v18 = vsel %vm48_vm0, %v55_v9, -inf  ;;  %v81_v21 = vrot.slane %v80_v16, 4  ;;  %v101_v25 = vsel %vm48_vm0, %v56_v10, -inf }
  0x10   :  { %v61_v19 = vmax.f32 %v59_v7, %v60_v12  ;;  %v68_v20 = vmax.f32 %v66_v8, %v67_v13  ;;  %v88_v22 = vrot.slane %v87_v17, 4  ;;  %v75_v23 = vmax.f32 %v73_v14, %v74_v15  ;;  %v191_v12 = vld [vmem:[%s299_s2] ss:$0 sm:$0xff] }
  0x11   :  { %v95_v24 = vrot.slane %v94_v18, 4  ;;  %v108_v26 = vsel %vm48_vm0, %v57_v11, -inf  ;;  %vm128_vm3 = vcmask 1043459   ;;  %v82_v29 = vmax.f32 %v80_v16, %v81_v21 }
  0x12   :  { %v62_v27 = vrot.slane %v61_v19, 2  ;;  %v69_v28 = vrot.slane %v68_v20, 2  ;;  %v89_v30 = vmax.f32 %v87_v17, %v88_v22  ;;  %vm130_vm4 = vcmask 1044484  }
  0x13   :  { %v76_v31 = vrot.slane %v75_v23, 2  ;;  %v96_v32 = vmax.f32 %v94_v18, %v95_v24  ;;  %v102_v33 = vrot.slane %v101_v25, 4  ;;  %v109_v34 = vrot.slane %v108_v26, 4  ;;  %v115_v6 = vld [vmem:[#allocation2] sm:$0xff] }
  0x14   :  { %v63_v35 = vmax.f32 %v61_v19, %v62_v27  ;;  %v70_v36 = vmax.f32 %v68_v20, %v69_v28  ;;  %v83_v37 = vrot.slane %v82_v29, 2  ;;  %v90_v38 = vrot.slane %v89_v30, 2 }
  0x15   :  { %v77_v39 = vmax.f32 %v75_v23, %v76_v31  ;;  %v97_v40 = vrot.slane %v96_v32, 2  ;;  %v103_v41 = vmax.f32 %v101_v25, %v102_v33  ;;  %v110_v42 = vmax.f32 %v108_v26, %v109_v34 }
  0x16   :  { %v64_v43 = vrot.slane %v63_v35, 1  ;;  %v71_v44 = vrot.slane %v70_v36, 1  ;;  %v84_v45 = vmax.f32 %v82_v29, %v83_v37  ;;  %v91_v46 = vmax.f32 %v89_v30, %v90_v38 }
  0x17   :  { %v78_v47 = vrot.slane %v77_v39, 1  ;;  %v98_v48 = vmax.f32 %v96_v32, %v97_v40  ;;  %v104_v49 = vrot.slane %v103_v41, 2  ;;  %v111_v50 = vrot.slane %v110_v42, 2 }
  0x18   :  { %v65_v51 = vmax.f32 %v63_v35, %v64_v43  ;;  %v72_v52 = vmax.f32 %v70_v36, %v71_v44  ;;  %v85_v53 = vrot.slane %v84_v45, 1  ;;  %v92_v54 = vrot.slane %v91_v46, 1 }
  0x19   :  { %v79_v55 = vmax.f32 %v77_v39, %v78_v47  ;;  %v99_v56 = vrot.slane %v98_v48, 1  ;;  %v105_v57 = vmax.f32 %v103_v41, %v104_v49  ;;  %v112_v58 = vmax.f32 %v110_v42, %v111_v50 }
  0x1a   :  { %v86_v59 = vmax.f32 %v84_v45, %v85_v53  ;;  %v93_v60 = vmax.f32 %v91_v46, %v92_v54  ;;  %v125_v61 = vsel %vm124_vm1, %v72_v52, %v65_v51  ;;  %vm132_vm5 = vcmask 1045509  }
  0x1b   :  { %v100_v62 = vmax.f32 %v98_v48, %v99_v56  ;;  %v106_v63 = vrot.slane %v105_v57, 1  ;;  %v113_v0 = vrot.slane %v112_v58, 1  ;;  %v127_v1 = vsel %vm126_vm2, %v79_v55, %v125_v61 }
  0x1c   :  { %v129_v2 = vsel %vm128_vm3, %v86_v59, %v127_v1  ;;  %vm134_vm6 = vcmask 1046534   ;;  %vm136_vm7 = vcmask 1047559   ;;  %vm176_vm8 = vcmask 31744  }
  0x1d   :  { %v107_v3 = vmax.f32 %v105_v57, %v106_v63  ;;  %v114_v4 = vmax.f32 %v112_v58, %v113_v0  ;;  %v131_v5 = vsel %vm130_vm4, %v93_v60, %v129_v2 }
  0x1e   :  { %v133_v7 = vsel %vm132_vm5, %v100_v62, %v131_v5 }
  0x1f   :  { %v135_v8 = vsel %vm134_vm6, %v107_v3, %v133_v7 }
  0x20   :  { %v137_v9 = vsel %vm136_vm7, %v114_v4, %v135_v8 }
  0x21   :  { %v139_v10 = vmax.f32 %v115_v6, %v137_v9 }
  0x23   :  { %140 = vst.msk [vmem:[#allocation2] sm:$0xff] %vm48_vm0, %v139_v10 }
  0x2a   :  { %v144_v11 = vld [vmem:[#allocation2] sm:$0xff] }
  0x2b   :  { %185 = vmatmul.msk.f32.vlgmr.msra.gmra.mxu0 %vm48_vm0, %v144_v11 }
  0xa8   :  { %v173_v13 = vpop.f32.mrf.mxu0 }
  0xa9   :  { %v174_v14 = vadd.f32 %v191_v12, %v173_v13 }
  0xab   :  { %177 = vst.msk [vmem:[%s300_s3] sm:$0xff] %vm176_vm8, %v174_v14 }
  0xac   :  { %182 = vsyncpa [#allocation4], 1 }
  0xad   :  { %183 = vsyncpa [#allocation6], 1 }

</bundles_post_ra>
